<compile_context>
chip_gen: v7x
topology: tpu7x:2x2x1
jax: 0.10.0
libtpu: 0.0.40
codegen_flags: <defaults>
</compile_context>

<pallas_src>
import functools

import jax
import jax.numpy as jnp
from jax.experimental import pallas as pl
from jax.experimental.pallas import tpu as pltpu


def _round_up(x, m):
    return ((x + m - 1) // m) * m


def _critic_mlp_kernel(x_ref, w1_ref, b1_ref, w2_ref, b2_ref, w3_ref, b3_ref,
                       o_ref):
    """One batch tile: activations are [features, TB] (batch on lanes)."""
    x = x_ref[...].astype(jnp.float32)            # [F, TB]
    w1 = w1_ref[...]                              # [H, F]
    f_in = x.shape[0]

    # Layer 1: K = 3 (or 4) -> VPU broadcast FMAs instead of a degenerate
    # MXU matmul (static Python loop, F known at trace time).
    acc = w1[:, 0:1] * x[0:1, :]                  # [H, TB]
    for f in range(1, f_in):
        acc = acc + w1[:, f:f + 1] * x[f:f + 1, :]
    h1 = jnp.tanh(acc + b1_ref[...])              # [H, TB]

    # Layer 2: H x H -> MXU, f32 accumulation.
    h2 = jnp.tanh(
        jnp.dot(w2_ref[...], h1,
                preferred_element_type=jnp.float32,
                precision=jax.lax.Precision.HIGHEST)
        + b2_ref[...])                            # [H, TB]

    # Layer 3: N = 1 -> elementwise multiply + sublane (XLU) reduction.
    v = jnp.sum(w3_ref[...] * h2, axis=0, keepdims=True) + b3_ref[...]  # [1, TB]
    o_ref[...] = v.astype(o_ref.dtype)


@functools.partial(jax.jit, static_argnames=("state_action",))
def critic_forward(params, state, action=None, *, state_action=False):
    """JAX wrapper mirroring Critic.forward(); returns shape [B]."""
    if state_action:
        x = jnp.concatenate([state, action], axis=1)   # glue (torch.cat dim=1)
    else:
        x = state
    B, F = x.shape
    H = params["w1"].shape[0]

    # Batch tile on lanes: multiple of 128; cap at 512 (85%+ of HBM BW, and
    # well inside v7x's 64 MiB VMEM with double-buffering).
    TB = min(512, _round_up(B, 128))
    B_pad = _round_up(B, TB)

    x_t = x.T                                          # [F, B]  (layout plumbing)
    if B_pad != B:
        x_t = jnp.pad(x_t, ((0, 0), (0, B_pad - B)))

    out = pl.pallas_call(
        _critic_mlp_kernel,
        out_shape=jax.ShapeDtypeStruct((1, B_pad), jnp.float32),
        grid=(B_pad // TB,),
        in_specs=[
            pl.BlockSpec((F, TB), lambda i: (0, i)),   # x tile (streams)
            pl.BlockSpec((H, F), lambda i: (0, 0)),    # w1  (resident)
            pl.BlockSpec((H, 1), lambda i: (0, 0)),    # b1
            pl.BlockSpec((H, H), lambda i: (0, 0)),    # w2
            pl.BlockSpec((H, 1), lambda i: (0, 0)),    # b2
            pl.BlockSpec((H, 1), lambda i: (0, 0)),    # w3 (stored [H,1])
            pl.BlockSpec((1, 1), lambda i: (0, 0)),    # b3
        ],
        out_specs=pl.BlockSpec((1, TB), lambda i: (0, i)),  # lane-dense output
        compiler_params=pltpu.CompilerParams(
            dimension_semantics=("parallel",)),
    )(x_t, params["w1"], params["b1"], params["w2"], params["b2"],
      params["w3"], params["b3"])

    # value.squeeze(dim=1): take the valid batch columns of the [1, B_pad] slab.
    return out[0, :B]


def init_critic_params(key, hidden_size, state_action=False):
    """Deterministic synthetic init (PyTorch-Linear-style uniform fans).

    Weights are stored as [out, in] (PyTorch layout) so the kernel computes
    h = W @ x_t + b with activations [features, batch]; w3 is stored [H, 1].
    """
    in_dim = 3 + (1 if state_action else 0)
    ks = jax.random.split(key, 6)

    def linear(kw, kb, fan_in, fan_out):
        bound = 1.0 / jnp.sqrt(jnp.float32(fan_in))
        w = jax.random.uniform(kw, (fan_out, fan_in), jnp.float32, -bound, bound)
        b = jax.random.uniform(kb, (fan_out, 1), jnp.float32, -bound, bound)
        return w, b

    w1, b1 = linear(ks[0], ks[1], in_dim, hidden_size)
    w2, b2 = linear(ks[2], ks[3], hidden_size, hidden_size)
    w3, b3 = linear(ks[4], ks[5], hidden_size, 1)
    return {"w1": w1, "b1": b1, "w2": w2, "b2": b2,
            "w3": w3.T, "b3": b3}          # w3 kept as [H, 1], b3 as [1, 1]


def _reference_forward(params, state, action=None, *, state_action=False):
    """Pure-jnp reference for the correctness check."""
    x = (jnp.concatenate([state, action], axis=1) if state_action else state)
    x = x.astype(jnp.float32)
    hp = jax.lax.Precision.HIGHEST
    h1 = jnp.tanh(jnp.dot(x, params["w1"].T, precision=hp) + params["b1"].T)
    h2 = jnp.tanh(jnp.dot(h1, params["w2"].T, precision=hp) + params["b2"].T)
    v = jnp.dot(h2, params["w3"], precision=hp) + params["b3"]
    return v[:, 0]


if __name__ == "__main__":
    key = jax.random.PRNGKey(0)
    k_state, k_action, k_p1, k_p2 = jax.random.split(key, 4)

    batch, hidden = 8, 32
    state = jax.random.normal(k_state, (batch, 3), jnp.float32)
    action = jax.random.normal(k_action, (batch, 1), jnp.float32)

    # Default config: state_action=False, layer_norm=False.
    params = init_critic_params(k_p1, hidden, state_action=False)
    val = jax.block_until_ready(critic_forward(params, state))
    ref = _reference_forward(params, state)
    assert val.shape == (batch,)
    assert jnp.allclose(val, ref, atol=1e-5, rtol=1e-5), \
        float(jnp.max(jnp.abs(val - ref)))

    # state_action=True path (input dim 4, concat done in wrapper glue).
    params_sa = init_critic_params(k_p2, hidden, state_action=True)
    val_sa = jax.block_until_ready(
        critic_forward(params_sa, state, action, state_action=True))
    ref_sa = _reference_forward(params_sa, state, action, state_action=True)
    assert val_sa.shape == (batch,)
    assert jnp.allclose(val_sa, ref_sa, atol=1e-5, rtol=1e-5), \
        float(jnp.max(jnp.abs(val_sa - ref_sa)))

    # bf16 activation streaming (halves HBM bytes on the mem-bound roofline);
    # the kernel upcasts to f32 before VPU/EUP math (safe on v5e too).
    state_bf16 = state.astype(jnp.bfloat16)
    val_bf = jax.block_until_ready(critic_forward(params, state_bf16))
    ref_bf = _reference_forward(params, state_bf16.astype(jnp.float32))
    assert val_bf.shape == (batch,)
    assert jnp.allclose(val_bf, ref_bf, atol=1e-3, rtol=1e-3), \
        float(jnp.max(jnp.abs(val_bf - ref_bf)))

    print("KERNEL_OK")
</pallas_src>

<mosaic_0001>
module attributes {stable_mosaic.version = 11 : i64} {
  func.func @_critic_mlp_kernel(%arg0: i32, %arg1: memref<3x128xf32, #tpu.memory_space<vmem>>, %arg2: memref<32x3xf32, #tpu.memory_space<vmem>>, %arg3: memref<32x1xf32, #tpu.memory_space<vmem>>, %arg4: memref<32x32xf32, #tpu.memory_space<vmem>>, %arg5: memref<32x1xf32, #tpu.memory_space<vmem>>, %arg6: memref<32x1xf32, #tpu.memory_space<vmem>>, %arg7: memref<1x1xf32, #tpu.memory_space<vmem>>, %arg8: memref<1x128xf32, #tpu.memory_space<vmem>>) attributes {dimension_semantics = [#tpu.dimension_semantics<parallel>], iteration_bounds = array<i64: 1>, scalar_prefetch = 0 : i64, scratch_operands = 0 : i64, tpu.core_type = #tpu.core_type<tc>, window_params = [{transform_indices = @transform_0, window_bounds = array<i64: 3, 128>}, {pipeline_mode = #tpu.pipeline_mode<synchronous>, transform_indices = @transform_1, window_bounds = array<i64: 32, 3>}, {pipeline_mode = #tpu.pipeline_mode<synchronous>, transform_indices = @transform_2, window_bounds = array<i64: 32, 1>}, {pipeline_mode = #tpu.pipeline_mode<synchronous>, transform_indices = @transform_3, window_bounds = array<i64: 32, 32>}, {pipeline_mode = #tpu.pipeline_mode<synchronous>, transform_indices = @transform_4, window_bounds = array<i64: 32, 1>}, {pipeline_mode = #tpu.pipeline_mode<synchronous>, transform_indices = @transform_5, window_bounds = array<i64: 32, 1>}, {pipeline_mode = #tpu.pipeline_mode<synchronous>, transform_indices = @transform_6, window_bounds = array<i64: 1, 1>}, {transform_indices = @transform_7, window_bounds = array<i64: 1, 128>}]} {
    %c0 = arith.constant 0 : index
    %c0_0 = arith.constant 0 : index
    %0 = vector.load %arg1[%c0, %c0_0] : memref<3x128xf32, #tpu.memory_space<vmem>>, vector<3x128xf32>
    %c0_1 = arith.constant 0 : index
    %c0_2 = arith.constant 0 : index
    %1 = vector.load %arg2[%c0_1, %c0_2] : memref<32x3xf32, #tpu.memory_space<vmem>>, vector<32x3xf32>
    %2 = vector.extract_strided_slice %1 {offsets = [0, 0], sizes = [32, 1], strides = [1, 1]} : vector<32x3xf32> to vector<32x1xf32>
    %3 = vector.extract_strided_slice %0 {offsets = [0, 0], sizes = [1, 128], strides = [1, 1]} : vector<3x128xf32> to vector<1x128xf32>
    %4 = vector.broadcast %2 : vector<32x1xf32> to vector<32x128xf32>
    %5 = vector.broadcast %3 : vector<1x128xf32> to vector<32x128xf32>
    %6 = arith.mulf %4, %5 : vector<32x128xf32>
    %7 = vector.extract_strided_slice %1 {offsets = [0, 1], sizes = [32, 1], strides = [1, 1]} : vector<32x3xf32> to vector<32x1xf32>
    %8 = vector.extract_strided_slice %0 {offsets = [1, 0], sizes = [1, 128], strides = [1, 1]} : vector<3x128xf32> to vector<1x128xf32>
    %9 = vector.broadcast %7 : vector<32x1xf32> to vector<32x128xf32>
    %10 = vector.broadcast %8 : vector<1x128xf32> to vector<32x128xf32>
    %11 = arith.mulf %9, %10 : vector<32x128xf32>
    %12 = arith.addf %6, %11 : vector<32x128xf32>
    %13 = vector.extract_strided_slice %1 {offsets = [0, 2], sizes = [32, 1], strides = [1, 1]} : vector<32x3xf32> to vector<32x1xf32>
    %14 = vector.extract_strided_slice %0 {offsets = [2, 0], sizes = [1, 128], strides = [1, 1]} : vector<3x128xf32> to vector<1x128xf32>
    %15 = vector.broadcast %13 : vector<32x1xf32> to vector<32x128xf32>
    %16 = vector.broadcast %14 : vector<1x128xf32> to vector<32x128xf32>
    %17 = arith.mulf %15, %16 : vector<32x128xf32>
    %18 = arith.addf %12, %17 : vector<32x128xf32>
    %c0_3 = arith.constant 0 : index
    %c0_4 = arith.constant 0 : index
    %19 = vector.load %arg3[%c0_3, %c0_4] : memref<32x1xf32, #tpu.memory_space<vmem>>, vector<32x1xf32>
    %20 = vector.broadcast %19 : vector<32x1xf32> to vector<32x128xf32>
    %21 = arith.addf %18, %20 : vector<32x128xf32>
    %22 = math.tanh %21 : vector<32x128xf32>
    %c0_5 = arith.constant 0 : index
    %c0_6 = arith.constant 0 : index
    %23 = vector.load %arg4[%c0_5, %c0_6] : memref<32x32xf32, #tpu.memory_space<vmem>>, vector<32x32xf32>
    %cst = arith.constant dense<0.000000e+00> : vector<32x128xf32>
    %24 = tpu.matmul %23, %22, %cst {dimension_numbers = #tpu.dot_dimension_numbers<[1], [0], [0], [1], [0, 0, 1, 1], [], []>, precision = #tpu.contract_precision<fp32>} : vector<32x32xf32>, vector<32x128xf32>, vector<32x128xf32> -> vector<32x128xf32>
    %c0_7 = arith.constant 0 : index
    %c0_8 = arith.constant 0 : index
    %25 = vector.load %arg5[%c0_7, %c0_8] : memref<32x1xf32, #tpu.memory_space<vmem>>, vector<32x1xf32>
    %26 = vector.broadcast %25 : vector<32x1xf32> to vector<32x128xf32>
    %27 = arith.addf %24, %26 : vector<32x128xf32>
    %28 = math.tanh %27 : vector<32x128xf32>
    %c0_9 = arith.constant 0 : index
    %c0_10 = arith.constant 0 : index
    %29 = vector.load %arg6[%c0_9, %c0_10] : memref<32x1xf32, #tpu.memory_space<vmem>>, vector<32x1xf32>
    %30 = vector.broadcast %29 : vector<32x1xf32> to vector<32x128xf32>
    %31 = arith.mulf %30, %28 : vector<32x128xf32>
    %cst_11 = arith.constant dense<0.000000e+00> : vector<128xf32>
    %32 = vector.multi_reduction <add>, %31, %cst_11 [0] : vector<32x128xf32> to vector<128xf32>
    %33 = vector.shape_cast %32 : vector<128xf32> to vector<1x128xf32>
    %c0_12 = arith.constant 0 : index
    %c0_13 = arith.constant 0 : index
    %34 = vector.load %arg7[%c0_12, %c0_13] : memref<1x1xf32, #tpu.memory_space<vmem>>, vector<1x1xf32>
    %35 = vector.broadcast %34 : vector<1x1xf32> to vector<1x128xf32>
    %36 = arith.addf %33, %35 : vector<1x128xf32>
    %c0_14 = arith.constant 0 : index
    %c0_15 = arith.constant 0 : index
    %37 = vector.load %arg8[%c0_14, %c0_15] : memref<1x128xf32, #tpu.memory_space<vmem>>, vector<1x128xf32>
    tpu.vector_store %arg8[%c0_14, %c0_15], %36 {strides = array<i32>} : memref<1x128xf32, #tpu.memory_space<vmem>>, vector<1x128xf32>,
    return
  }
  func.func @transform_0(%arg0: i32) -> (i32, i32) {
    %c0_i32 = arith.constant 0 : i32
    %c0_i32_0 = arith.constant 0 : i32
    return %c0_i32, %arg0 : i32, i32
  }
  func.func @transform_1(%arg0: i32) -> (i32, i32) {
    %c0_i32 = arith.constant 0 : i32
    %c0_i32_0 = arith.constant 0 : i32
    %c0_i32_1 = arith.constant 0 : i32
    return %c0_i32, %c0_i32_0 : i32, i32
  }
  func.func @transform_2(%arg0: i32) -> (i32, i32) {
    %c0_i32 = arith.constant 0 : i32
    %c0_i32_0 = arith.constant 0 : i32
    %c0_i32_1 = arith.constant 0 : i32
    return %c0_i32, %c0_i32_0 : i32, i32
  }
  func.func @transform_3(%arg0: i32) -> (i32, i32) {
    %c0_i32 = arith.constant 0 : i32
    %c0_i32_0 = arith.constant 0 : i32
    %c0_i32_1 = arith.constant 0 : i32
    return %c0_i32, %c0_i32_0 : i32, i32
  }
  func.func @transform_4(%arg0: i32) -> (i32, i32) {
    %c0_i32 = arith.constant 0 : i32
    %c0_i32_0 = arith.constant 0 : i32
    %c0_i32_1 = arith.constant 0 : i32
    return %c0_i32, %c0_i32_0 : i32, i32
  }
  func.func @transform_5(%arg0: i32) -> (i32, i32) {
    %c0_i32 = arith.constant 0 : i32
    %c0_i32_0 = arith.constant 0 : i32
    %c0_i32_1 = arith.constant 0 : i32
    return %c0_i32, %c0_i32_0 : i32, i32
  }
  func.func @transform_6(%arg0: i32) -> (i32, i32) {
    %c0_i32 = arith.constant 0 : i32
    %c0_i32_0 = arith.constant 0 : i32
    %c0_i32_1 = arith.constant 0 : i32
    return %c0_i32, %c0_i32_0 : i32, i32
  }
  func.func @transform_7(%arg0: i32) -> (i32, i32) {
    %c0_i32 = arith.constant 0 : i32
    %c0_i32_0 = arith.constant 0 : i32
    return %c0_i32, %arg0 : i32, i32
  }
}

</mosaic_0001>

<bundles_post_ra>
// kernel: critic_forward.1
= control target key start
LH: loop header
LB: loop body
LE: loop exit
PB: predicated region body
PF: predicated region fallthrough
CT: control target
= control target key end

     0   :  { %v1092_v0 = vmov 2   ;;  %v1093_v1 = vmov 1   ;;  %v1094_v6 = vmov 0   ;;  %vm177_vm0 = vcmask 261120   ;;  %s1277_s1 = inlined_call_operand.vmem [shape: f32[32,3], index: 1, kind: input, shape index: {}]   ;;  %s1278_s6 = inlined_call_operand.<no memory space> [shape: f32[1,1], index: 6, kind: input, shape index: {}]   ;;  %s1279_s2 = inlined_call_operand.vmem [shape: f32[32,1], index: 2, kind: input, shape index: {}]   ;;  %s1280_s4 = inlined_call_operand.vmem [shape: f32[32,1], index: 4, kind: input, shape index: {}]   ;;  %s1281_s5 = inlined_call_operand.vmem [shape: f32[32,1], index: 5, kind: input, shape index: {}]   ;;  %s1282_s3 = inlined_call_operand.vmem [shape: f32[32,32], index: 3, kind: input, shape index: {}]   ;;  %s1283_s0 = inlined_call_operand.vmem [shape: f32[3,128], index: 0, kind: input, shape index: {}]   ;;  %s1284_s7 = inlined_call_operand.vmem [shape: f32[1,128], index: 7, kind: output, shape index: {}]  }
   0x1   :  { %1069 = vset.pattern.permute.xlu0 %v1092_v0  ;;  %1068 = vset.pattern.permute.xlu1 %v1093_v1  ;;  %v29_v2 = vld [vmem:[%s1277_s1] sm:$0xff]  ;;  %v12_v3 = vstv %s1278_s6  ;;  %v31_v4 = vld [vmem:[%s1277_s1 + $0x10] sm:$0xff]  ;;  %v30_v5 = vld [vmem:[%s1277_s1 + $0x8] sm:$0xff]  ;;  %v53_v36 = vlaneseq }
   0x2   :  { %90 = vperm.xlu0 %1069, %v29_v2   ;;  %62 = vperm.xlu1 %1068, %v29_v2   ;;  %13 = vst [vmem:[#allocation2] sm:$0x1] %v12_v3  ;;  %v32_v7 = vld [vmem:[%s1277_s1 + $0x18] sm:$0xff]  ;;  %v118_v8 = vld [vmem:[%s1279_s2 + $0x8] sm:$0xff]  ;;  %v153_v9 = vld [vmem:[%s1280_s4] sm:$0xff] }
   0x3   :  { %v155_v10 = vld [vmem:[%s1280_s4 + $0x10] sm:$0xff]  ;;  %v808_v11 = vld [vmem:[%s1281_s5] sm:$0xff]  ;;  %v120_v16 = vld [vmem:[%s1279_s2 + $0x18] sm:$0xff]  ;;  %v1211_v39 = vshrl.u32 %v53_v36, 7 }
   0x4   :  { %v117_v12 = vld [vmem:[%s1279_s2] sm:$0xff]  ;;  %v810_v13 = vld [vmem:[%s1281_s5 + $0x10] sm:$0xff]  ;;  %v154_v17 = vld [vmem:[%s1280_s4 + $0x8] sm:$0xff] }
   0x5   :  { %v119_v14 = vld [vmem:[%s1279_s2 + $0x10] sm:$0xff]  ;;  %v156_v18 = vld [vmem:[%s1280_s4 + $0x18] sm:$0xff]  ;;  %v149_v19 = vld [vmem:[%s1282_s3] sm:$0xff]  ;;  %v55_v40 = vsub.s32 0, %v1211_v39  ;;  %v79_v43 = vsub.s32 1, %v1211_v39  ;;  %v107_v45 = vsub.s32 2, %v1211_v39 }
   0x6   :  { %98 = vperm.xlu0 %1069, %v31_v4   ;;  %66 = vperm.xlu1 %1068, %v30_v5   ;;  %v809_v20 = vld [vmem:[%s1281_s5 + $0x8] sm:$0xff]  ;;  %v179_v21 = vsel %vm177_vm0, %v149_v19, 0  ;;  %v151_v26 = vld [vmem:[%s1282_s3 + $0x10] sm:$0xff]  ;;  %v811_v27 = vld [vmem:[%s1281_s5 + $0x18] sm:$0xff] }
   0x7   :  { %v150_v22 = vld [vmem:[%s1282_s3 + $0x8] sm:$0xff]  ;;  %v1189_v23 = vand.u32 4294901760, %v179_v21  ;;  %v1202_v28 = vsel %vm177_vm0, %v151_v26, 0  ;;  %v152_v29 = vld [vmem:[%s1282_s3 + $0x18] sm:$0xff]  ;;  %v28_v44 = vld [vmem:[%s1283_s0] sm:$0x7] }
   0x8   :  { %v1191_v24 = vsel %vm177_vm0, %v150_v22, 0  ;;  %v1208_v31 = vsel %vm177_vm0, %v152_v29, 0  ;;  %v56_v46 = vrot.slane %v28_v44, %v55_v40  ;;  %v80_v48 = vrot.slane %v28_v44, %v79_v43 }
   0x9   :  { %v845_v15 = vld [vmem:[#allocation2] sm:$0x1]  ;;  %v1194_v25 = vsub.f32 %v179_v21, %v1189_v23  ;;  %v108_v51 = vrot.slane %v28_v44, %v107_v45  ;;  %v1222_v21 = vand.u32 4294901760, %v1191_v24  ;;  %v1225_v26 = vand.u32 4294901760, %v1202_v28 }
   0xa   :  { %1073 = vset.pattern.permute.xlu0 %v1094_v6  ;;  %1070 = vset.pattern.permute.xlu1 %v1092_v0 }
   0xb   :  { %35 = vperm.xlu0 %1073, %v29_v2   ;;  %94 = vperm.xlu1 %1070, %v30_v5   ;;  %v261_v30 = vand.u32 4294901760, %v1194_v25  ;;  %v1229_v29 = vsub.f32 %v1191_v24, %v1222_v21  ;;  %v1238_v36 = vsub.f32 %v1202_v28, %v1225_v26 }
   0xd   :  { %v262_v32 = vsub.f32 %v1194_v25, %v261_v30  ;;  %959 = vmatprep.mubr.f32.mxu0 %v261_v30  ;;  %v1232_v30 = vand.u32 4294901760, %v1208_v31  ;;  %v281_v45 = vand.u32 4294901760, %v1238_v36 }
   0xf   :  { %40 = vperm.xlu0 %1073, %v30_v5   ;;  %1071 = vset.pattern.permute.xlu1 %v1094_v6  ;;  %v263_v33 = vand.u32 4294901760, %v262_v32 }
  0x10   :  { %45 = vperm.xlu1 %1071, %v31_v4  }
  0x11   :  { %917 = vmatprep.mubr.f32.mxu1 %v263_v33 }
  0x13   :  { %50 = vperm.xlu0 %1073, %v32_v7  }
  0x14   :  { %1072 = vset.pattern.permute.xlu1 %v1093_v1 }
  0x15   :  { %70 = vperm.xlu1 %1072, %v31_v4  }
  0x17   :  { %128 = vperm.xlu0 %1073, %v118_v8  }
  0x19   :  { %74 = vperm.xlu1 %1072, %v32_v7  }
  0x1b   :  { %159 = vperm.xlu0 %1073, %v153_v9  }
  0x1d   :  { %1074 = vset.pattern.permute.xlu1 %v1092_v0 }
  0x1e   :  { %102 = vperm.xlu1 %1074, %v32_v7  }
  0x1f   :  { %169 = vperm.xlu0 %1073, %v155_v10  }
  0x22   :  { %1075 = vset.pattern.permute.xlu1 %v1094_v6 }
  0x23   :  { %814 = vperm.xlu0 %1073, %v808_v11   ;;  %123 = vperm.xlu1 %1075, %v117_v12  }
  0x27   :  { %824 = vperm.xlu0 %1073, %v810_v13   ;;  %133 = vperm.xlu1 %1075, %v119_v14  }
  0x2b   :  { %848 = vperm.xlu0 %1073, %v845_v15   ;;  %138 = vperm.xlu1 %1075, %v120_v16  }
  0x2f   :  { %164 = vperm.xlu1 %1075, %v154_v17  }
  0x33   :  { %174 = vperm.xlu1 %1075, %v156_v18  }
  0x37   :  { %819 = vperm.xlu1 %1075, %v809_v20  }
  0x3b   :  { %829 = vperm.xlu1 %1075, %v811_v27  }
  0x81   :  { %v63_v34 = vpop.permute.xlu1 %62  ;;  %v91_v35 = vpop.permute.xlu0 %90 }
  0x82   :  { %v81_v62 = vmul.f32 %v80_v48, %v63_v34  ;;  %v109_v63 = vmul.f32 %v108_v51, %v91_v35 }
  0x85   :  { %v67_v37 = vpop.permute.xlu1 %66  ;;  %v99_v38 = vpop.permute.xlu0 %98 }
  0x86   :  { %v82_v52 = vmul.f32 %v80_v48, %v67_v37  ;;  %v111_v7 = vmul.f32 %v108_v51, %v99_v38  ;;  %v271_v38 = vand.u32 4294901760, %v1229_v29 }
  0x8a   :  { %v36_v41 = vpop.permute.xlu0 %35  ;;  %v95_v42 = vpop.permute.xlu1 %94 }
  0x8b   :  { %v110_v56 = vmul.f32 %v108_v51, %v95_v42  ;;  %v57_v60 = vmul.f32 %v56_v46, %v36_v41  ;;  %v1243_v41 = vsub.f32 %v1208_v31, %v1232_v30 }
  0x8d   :  { %v85_v0 = vadd.f32 %v81_v62, %v57_v60  ;;  %v291_v31 = vand.u32 4294901760, %v1243_v41 }
  0x8e   :  { %v41_v47 = vpop.permute.xlu0 %40 }
  0x8f   :  { %v58_v49 = vmul.f32 %v56_v46, %v41_v47  ;;  %v46_v50 = vpop.permute.xlu1 %45  ;;  %v113_v5 = vadd.f32 %v109_v63, %v85_v0  ;;  %v272_v47 = vsub.f32 %v1229_v29, %v271_v38 }
  0x90   :  { %v59_v3 = vmul.f32 %v56_v46, %v46_v50 }
  0x91   :  { %v86_v54 = vadd.f32 %v82_v52, %v58_v49 }
  0x92   :  { %v51_v53 = vpop.permute.xlu0 %50 }
  0x93   :  { %v114_v58 = vadd.f32 %v110_v56, %v86_v54  ;;  %v60_v8 = vmul.f32 %v56_v46, %v51_v53  ;;  %v282_v54 = vsub.f32 %v1238_v36, %v281_v45  ;;  %v292_v56 = vsub.f32 %v1243_v41, %v291_v31 }
  0x94   :  { %v71_v55 = vpop.permute.xlu1 %70 }
  0x95   :  { %v83_v1 = vmul.f32 %v80_v48, %v71_v55  ;;  %v273_v55 = vand.u32 4294901760, %v272_v47  ;;  %v293_v0 = vand.u32 4294901760, %v292_v56 }
  0x96   :  { %v129_v57 = vpop.permute.xlu0 %128 }
  0x97   :  { %v142_v61 = vadd.f32 %v129_v57, %v114_v58  ;;  %v87_v4 = vadd.f32 %v83_v1, %v59_v3 }
  0x98   :  { %v75_v59 = vpop.permute.xlu1 %74 }
  0x99   :  { %1076 = vtanh.f32 %v142_v61  ;;  %v84_v9 = vmul.f32 %v80_v48, %v75_v59  ;;  %v115_v12 = vadd.f32 %v111_v7, %v87_v4  ;;  %v283_v61 = vand.u32 4294901760, %v282_v54 }
  0x9b   :  { %v88_v15 = vadd.f32 %v84_v9, %v60_v8 }
  0x9d   :  { %v103_v2 = vpop.permute.xlu1 %102 }
  0x9e   :  { %v112_v11 = vmul.f32 %v108_v51, %v103_v2 }
  0xa0   :  { %v116_v17 = vadd.f32 %v112_v11, %v88_v15 }
  0xa2   :  { %v124_v6 = vpop.permute.xlu1 %123 }
  0xa3   :  { %v141_v10 = vadd.f32 %v124_v6, %v113_v5  ;;  %v1077_v14 = vpop.eup %1076  ;;  %v160_v6 = vpop.permute.xlu0 %159 }
  0xa4   :  { %v194_v18 = vand.u32 4294901760, %v1077_v14 }
  0xa5   :  { %1078 = vtanh.f32 %v141_v10 }
  0xa6   :  { %v134_v13 = vpop.permute.xlu1 %133  ;;  %v308_v22 = vsub.f32 %v1077_v14, %v194_v18 }
  0xa7   :  { %v143_v16 = vadd.f32 %v134_v13, %v115_v12  ;;  %v170_v12 = vpop.permute.xlu0 %169 }
  0xa8   :  { %v309_v35 = vand.u32 4294901760, %v308_v22 }
  0xa9   :  { %1080 = vtanh.f32 %v143_v16 }
  0xaa   :  { %v139_v19 = vpop.permute.xlu1 %138  ;;  %v310_v28 = vsub.f32 %v308_v22, %v309_v35 }
  0xab   :  { %v144_v20 = vadd.f32 %v139_v19, %v116_v17 }
  0xac   :  { %v311_v52 = vand.u32 4294901760, %v310_v28 }
  0xad   :  { %1082 = vtanh.f32 %v144_v20 }
  0xae   :  { %v165_v7 = vpop.permute.xlu1 %164 }
  0xaf   :  { %v1079_v27 = vpop.eup %1078 }
  0xb0   :  { %v191_v32 = vand.u32 4294901760, %v1079_v27 }
  0xb2   :  { %v1234_v33 = vpack.c.bf16 %v194_v18, %v191_v32  ;;  %v301_v34 = vsub.f32 %v1079_v27, %v191_v32  ;;  %v175_v14 = vpop.permute.xlu1 %174  ;;  %v815_v27 = vpop.permute.xlu0 %814 }
  0xb3   :  { %v1081_v37 = vpop.eup %1080 }
  0xb4   :  { %v197_v24 = vand.u32 4294901760, %v1081_v37  ;;  %994 = vmatprep.subr.bf16.mxu1 %v1234_v33  ;;  %1018 = vmatprep.subr.bf16.mxu0 %v1234_v33  ;;  %v302_v42 = vand.u32 4294901760, %v301_v34  ;;  %v1009_v4 = vpack.c.bf16 %v308_v22, %v301_v34 }
  0xb5   :  { %996 = vmatpush3.bf16.msra.mxu1 %v1234_v33  ;;  %1020 = vmatpush3.bf16.msra.mxu0 %v1234_v33 }
  0xb6   :  { %v303_v43 = vsub.f32 %v301_v34, %v302_v42  ;;  %v315_v44 = vsub.f32 %v1081_v37, %v197_v24  ;;  %v1025_v58 = vpack.c.bf16 %v309_v35, %v302_v42 }
  0xb7   :  { %v1083_v46 = vpop.eup %1082 }
  0xb8   :  { %v200_v48 = vand.u32 4294901760, %v1083_v46  ;;  %v304_v49 = vand.u32 4294901760, %v303_v43  ;;  %v316_v50 = vand.u32 4294901760, %v315_v44 }
  0xba   :  { %v997_v51 = vpack.c.bf16 %v200_v48, %v197_v24  ;;  %v322_v53 = vsub.f32 %v1083_v46, %v200_v48  ;;  %v1001_v57 = vpack.c.bf16 %v311_v52, %v304_v49  ;;  %v317_v60 = vsub.f32 %v315_v44, %v316_v50 }
  0xbc   :  { %998 = vmatprep.subr.bf16.mxu1 %v997_v51  ;;  %1022 = vmatprep.subr.bf16.mxu0 %v997_v51  ;;  %v323_v59 = vand.u32 4294901760, %v322_v53  ;;  %v318_v1 = vand.u32 4294901760, %v317_v60  ;;  %v1013_v5 = vpack.c.bf16 %v322_v53, %v315_v44 }
  0xbd   :  { %1000 = vmatpush3.bf16.msra.mxu1 %v997_v51  ;;  %1024 = vmatpush3.bf16.msra.mxu0 %v997_v51 }
  0xbe   :  { %1002 = vmatprep.subr.bf16.mxu1 %v1001_v57  ;;  %1026 = vmatprep.subr.bf16.mxu0 %v1025_v58  ;;  %v324_v62 = vsub.f32 %v322_v53, %v323_v59  ;;  %v1029_v63 = vpack.c.bf16 %v323_v59, %v316_v50 }
  0xc0   :  { %918 = vmatmul.mubr.f32.vlgmr.msra.gmra.mrb[0].mxu1 %v273_v55  ;;  %960 = vmatmul.mubr.f32.vlgmr.msra.gmra.mrb[0].mxu0 %v271_v38  ;;  %v325_v2 = vand.u32 4294901760, %v324_v62  ;;  %v825_v38 = vpop.permute.xlu0 %824 }
  0xc1   :  { %1004 = vmatpush3.bf16.msra.mxu1 %v1001_v57  ;;  %1028 = vmatpush3.bf16.msra.mxu0 %v1025_v58 }
  0xc2   :  { %1030 = vmatprep.subr.bf16.mxu0 %v1029_v63  ;;  %920 = vmatprep.mubr.f32.mxu1 %v283_v61  ;;  %v1005_v3 = vpack.c.bf16 %v325_v2, %v318_v1 }
  0xc3   :  { %962 = vmatprep.mubr.f32.mxu0 %v281_v45 }
  0xc4   :  { %921 = vmatmul.mubr.f32.gmra.mrb[2].mxu1 %v293_v0  ;;  %1006 = vmatprep.subr.bf16.mxu1 %v1005_v3 }
  0xc5   :  { %963 = vmatmul.mubr.f32.gmra.mrb[2].mxu0 %v291_v31  ;;  %1008 = vmatpush3.bf16.msra.mxu1 %v1005_v3  ;;  %v849_v31 = vpop.permute.xlu0 %848 }
  0xc6   :  { %1032 = vmatpush3.bf16.msra.mxu0 %v1029_v63  ;;  %1010 = vmatprep.subr.bf16.mxu1 %v1009_v4  ;;  %v854_v49 = vrot.slane %v849_v31, %v55_v40 }
  0xc7   :  { %1034 = vmatprep.subr.bf16.mxu0 %v1234_v33  ;;  %931 = vmatprep.mubr.f32.mxu1 %v1189_v23 }
  0xc8   :  { %973 = vmatprep.mubr.f32.mxu0 %v1189_v23  ;;  %932 = vmatmul.mubr.f32.vlgmr.msra.gmra.mrb[0].mxu1 %v1222_v21 }
  0xc9   :  { %974 = vmatmul.mubr.f32.vlgmr.msra.gmra.mrb[0].mxu0 %v1222_v21  ;;  %1012 = vmatpush3.bf16.msra.mxu1 %v1009_v4 }
  0xca   :  { %1036 = vmatpush3.bf16.msra.mxu0 %v1234_v33  ;;  %1014 = vmatprep.subr.bf16.mxu1 %v1013_v5 }
  0xcb   :  { %1038 = vmatprep.subr.bf16.mxu0 %v997_v51  ;;  %934 = vmatprep.mubr.f32.mxu1 %v1225_v26 }
  0xcc   :  { %976 = vmatprep.mubr.f32.mxu0 %v1225_v26  ;;  %935 = vmatmul.mubr.f32.gmra.mrb[2].mxu1 %v1232_v30 }
  0xcd   :  { %977 = vmatmul.mubr.f32.gmra.mrb[2].mxu0 %v1232_v30  ;;  %1016 = vmatpush3.bf16.msra.mxu1 %v1013_v5 }
  0xce   :  { %1040 = vmatpush3.bf16.msra.mxu0 %v997_v51  ;;  %945 = vmatprep.mubr.f32.mxu1 %v1194_v25 }
  0xcf   :  { %987 = vmatprep.mubr.f32.mxu0 %v1189_v23 }
  0xd0   :  { %946 = vmatmul.mubr.f32.vlgmr.msra.gmra.mrb[0].mxu1 %v1229_v29 }
  0xd1   :  { %988 = vmatmul.mubr.f32.vlgmr.msra.gmra.mrb[0].mxu0 %v1222_v21  ;;  %948 = vmatprep.mubr.f32.mxu1 %v1238_v36 }
  0xd2   :  { %990 = vmatprep.mubr.f32.mxu0 %v1225_v26 }
  0xd4   :  { %949 = vmatmul.mubr.f32.gmra.mrb[2].mxu1 %v1243_v41 }
  0xd5   :  { %991 = vmatmul.mubr.f32.gmra.mrb[2].mxu0 %v1232_v30  ;;  %v820_v30 = vpop.permute.xlu1 %819 }
  0xd9   :  { %v830_v24 = vpop.permute.xlu1 %829 }
 0x1a3   :  { %v947_v8 = vpop.f32.mrb[0].mxu1 }
 0x1a4   :  { %v1041_v9 = vadd.f32 %v947_v8, %v165_v7  ;;  %v989_v10 = vpop.f32.mrb[0].mxu0  ;;  %v484_v25 = vpop.f32.mrb[1].mxu1 }
 0x1a5   :  { %v1043_v11 = vadd.f32 %v484_v25, %v160_v6  ;;  %v782_v23 = vpop.f32.mrb[1].mxu0 }
 0x1a6   :  { %v1042_v13 = vadd.f32 %v1041_v9, %v989_v10 }
 0x1a7   :  { %v1044_v15 = vadd.f32 %v1043_v11, %v782_v23  ;;  %v950_v16 = vpop.f32.mrb[2].mxu1 }
 0x1a8   :  { %1084 = vtanh.f32 %v1042_v13  ;;  %v1045_v17 = vadd.f32 %v950_v16, %v175_v14  ;;  %v992_v18 = vpop.f32.mrb[2].mxu0  ;;  %v498_v19 = vpop.f32.mrb[3].mxu1 }
 0x1a9   :  { %1086 = vtanh.f32 %v1044_v15  ;;  %v1047_v20 = vadd.f32 %v498_v19, %v170_v12  ;;  %v794_v21 = vpop.f32.mrb[3].mxu0 }
 0x1aa   :  { %v1046_v22 = vadd.f32 %v1045_v17, %v992_v18 }
 0x1ab   :  { %v1048_v26 = vadd.f32 %v1047_v20, %v794_v21 }
 0x1ac   :  { %1088 = vtanh.f32 %v1046_v22 }
 0x1ad   :  { %1090 = vtanh.f32 %v1048_v26 }
 0x1b2   :  { %v1085_v29 = vpop.eup %1084 }
 0x1b3   :  { %v1087_v32 = vpop.eup %1086  ;;  %v833_v33 = vmul.f32 %v1085_v29, %v820_v30 }
 0x1b4   :  { %v832_v34 = vmul.f32 %v1087_v32, %v815_v27 }
 0x1b6   :  { %v1089_v35 = vpop.eup %1088  ;;  %v836_v36 = vadd.f32 %v833_v33, %v832_v34 }
 0x1b7   :  { %v1091_v37 = vpop.eup %1090  ;;  %v835_v42 = vmul.f32 %v1089_v35, %v830_v24 }
 0x1b8   :  { %v834_v41 = vmul.f32 %v1091_v37, %v825_v38 }
 0x1ba   :  { %v837_v43 = vadd.f32 %v836_v36, %v834_v41 }
 0x1bc   :  { %v838_v28 = vadd.f32 %v837_v43, %v835_v42 }
 0x1be   :  { %v839_v44 = vrot.slane %v838_v28, 4 }
 0x1c0   :  { %v840_v45 = vadd.f32 %v839_v44, %v838_v28 }
 0x1c2   :  { %v841_v46 = vrot.slane %v840_v45, 2 }
 0x1c4   :  { %v842_v47 = vadd.f32 %v841_v46, %v840_v45 }
 0x1c6   :  { %v843_v48 = vrot.slane %v842_v47, 1 }
 0x1c8   :  { %v844_v50 = vadd.f32 %v843_v48, %v842_v47 }
 0x1ca   :  { %v855_v51 = vadd.f32 %v854_v49, %v844_v50 }
 0x1cc   :  { %856 = vst [vmem:[%s1284_s7] sm:$0x1] %v855_v51 }

</bundles_post_ra>
